<compile_context>
chip_gen: v5e
topology: v5e:2x2
jax: 0.10.0
libtpu: 0.0.40
codegen_flags: <defaults>
</compile_context>

<pallas_src>
import math

import jax
import jax.numpy as jnp
from jax import lax
from jax.experimental import pallas as pl
from jax.experimental.pallas import tpu as pltpu

EPS = 1e-5                    # InstanceNorm2d default eps
NEG_SLOPE = 0.2               # LeakyReLU negative_slope
MATMUL_DTYPE = jnp.bfloat16   # MXU operand / inter-layer activation dtype

_VMEM_LIMIT = None


def _round_up(x, m):
    return ((x + m - 1) // m) * m


def _vmem_limit_bytes():
    """~75% of physical VMEM: 48 MiB on v7x (64 MiB), 96 MiB on v5e/v6e (128 MiB)."""
    global _VMEM_LIMIT
    if _VMEM_LIMIT is None:
        try:
            cap = int(pltpu.get_tpu_info().vmem_capacity_bytes)
        except Exception:
            cap = 64 * 1024 * 1024          # conservative fallback (v7x physical)
        _VMEM_LIMIT = max(32 * 1024 * 1024, min((cap * 3) // 4, 100 * 1024 * 1024))
    return _VMEM_LIMIT


# ----------------------------------------------------------------------------
# Fused Conv2d(k=4, s=2) [+ bias] [+ InstanceNorm2d(affine=False)] [+ LeakyReLU]
# channel-major, phase-decomposed, lane-dense output (slab layout).
# ----------------------------------------------------------------------------
def conv4x4_s2_block(x, w, b, *, pads, do_in, do_act, use_bias, out_dtype):
    """x: (N, Cin, H, W); w: (Cout, Cin, 4, 4) f32 (PyTorch OIHW); b: (Cout,) or None.
    pads = (top, bottom, left, right) total zero pad.
    Returns (out_slab, meta): out_slab is (N, cout_pad, Pf) in `out_dtype`, lane
    l = i*Wph + j (wrap/pad lanes are garbage and must be cropped by consumers)."""
    N, Cin, H, W = x.shape
    Cout = w.shape[0]
    assert w.shape == (Cout, Cin, 4, 4)

    Hp, Wp = H + pads[0] + pads[1], W + pads[2] + pads[3]
    Ho, Wo = (Hp - 4) // 2 + 1, (Wp - 4) // 2 + 1
    Hph, Wph = Ho + 1, Wo + 1             # per-phase image size (incl. 1-halo)
    Lout = Ho * Wph                       # flat outputs incl. the wrap column
    Pf = _round_up(Hph * Wph, 128)        # lane-dense slab / output width
    K = 4 * Cin
    Kpad = _round_up(K, 16)
    cout_pad = _round_up(Cout, 16)
    if cout_pad > 128:
        ct = 128
        cout_pad = _round_up(cout_pad, 128)
    else:
        ct = cout_pad

    # ---- host-side phase slab: one fused bf16 pass, no im2col blow-up --------
    xb = x.astype(MATMUL_DTYPE)
    xp = jnp.pad(xb, ((0, 0), (0, 0), (pads[0], pads[1]), (pads[2], pads[3])))
    # space-to-depth: phase (a, b) image p_ab[i, j] = xp[2i + a, 2j + b]
    phases = [xp[:, :, a:a + 2 * Ho + 1:2, bb:bb + 2 * Wo + 1:2]
              for a in (0, 1) for bb in (0, 1)]            # 4 x (N, Cin, Hph, Wph)
    slab = jnp.stack(phases, axis=1).reshape(N, K, Hph * Wph)
    slab = jnp.pad(slab, ((0, 0), (0, Kpad - K), (0, Pf - Hph * Wph)))

    # weights (Cout, Cin, ky, kx) -> wq[q, co, (a*2+b)*Cin + ci],
    # ky = 2*qy + a, kx = 2*qx + b, q = qy*2 + qx;  pre-cast to bf16 (MXU-native)
    wq = w.reshape(Cout, Cin, 2, 2, 2, 2)                  # (co, ci, qy, a, qx, b)
    wq = wq.transpose(2, 4, 3, 5, 0, 1)                    # (qy, qx, a, b, co, ci)
    wq = wq.reshape(4, 2, 2, Cout, Cin)                    # (q, a, b, co, ci)
    wq = wq.transpose(0, 3, 1, 2, 4).reshape(4, Cout, K)   # (q, co, k)
    wq = jnp.pad(wq, ((0, 0), (0, cout_pad - Cout), (0, Kpad - K))).astype(MATMUL_DTYPE)

    if b is None:
        b_arr = jnp.zeros((cout_pad, 1), jnp.float32)
    else:
        b_arr = jnp.pad(b.astype(jnp.float32), (0, cout_pad - Cout)).reshape(cout_pad, 1)

    inv_cnt = 1.0 / float(Ho * Wo)
    shifts = (0, 1, Wph, Wph + 1)          # output l reads phase lane l + shift[q]

    # ---- Pallas kernel --------------------------------------------------------
    def kernel(ph_ref, w_ref, b_ref, o_ref, acc_ref):
        ph = ph_ref[0]                                     # (Kpad, Pf) bf16
        # 4 phase sub-matmuls over the full (aligned) lane width; realign each
        # result with an XLU lane rotate and accumulate into the f32 scratch.
        for q in range(4):
            part = jnp.dot(w_ref[q], ph, preferred_element_type=jnp.float32)
            if shifts[q]:
                part = pltpu.roll(part, shift=Pf - shifts[q], axis=1)
            if q == 0:
                acc_ref[...] = part
            else:
                acc_ref[...] += part
        z = acc_ref[...]                                   # (ct, Pf) f32
        if use_bias:
            z = z + b_ref[...]                             # (ct, 1) broadcast
        if do_in:
            # In-kernel valid-lane mask: l < Lout and (l mod Wph) < Wo.
            # Float floor-div is exact here: |rel err| <= ~2.4e-7 and the true
            # value is >= 0.5/Wph away from integer boundaries (Pf << 2e6).
            lane = lax.broadcasted_iota(jnp.int32, (1, Pf), 1).astype(jnp.float32)
            row = jnp.floor((lane + 0.5) * (1.0 / Wph))
            col = lane - row * float(Wph)
            mask = ((lane < float(Lout)) & (col < float(Wo))).astype(jnp.float32)
            zm = z * mask
            mean = jnp.sum(zm, axis=1, keepdims=True) * inv_cnt
            ex2 = jnp.sum(zm * z, axis=1, keepdims=True) * inv_cnt
            var = jnp.maximum(ex2 - mean * mean, 0.0)      # clamp f32 cancellation
            z = (z - mean) * lax.rsqrt(var + EPS)
        if do_act:
            z = jnp.where(z >= 0, z, NEG_SLOPE * z)
        o_ref[0] = z.astype(o_ref.dtype)

    out = pl.pallas_call(
        kernel,
        out_shape=jax.ShapeDtypeStruct((N, cout_pad, Pf), out_dtype),
        # n OUTER, c INNER: slab block index depends only on n -> stays resident.
        grid=(N, cout_pad // ct),
        in_specs=[
            pl.BlockSpec((1, Kpad, Pf), lambda n, c: (n, 0, 0)),
            pl.BlockSpec((4, ct, Kpad), lambda n, c: (0, c, 0)),
            pl.BlockSpec((ct, 1), lambda n, c: (c, 0)),
        ],
        out_specs=pl.BlockSpec((1, ct, Pf), lambda n, c: (n, c, 0)),
        scratch_shapes=[pltpu.VMEM((ct, Pf), jnp.float32)],
        compiler_params=pltpu.CompilerParams(
            dimension_semantics=("parallel", "parallel"),
            vmem_limit_bytes=_vmem_limit_bytes()),
    )(slab, wq, b_arr)

    return out, (Cout, Ho, Wo, Wph)


def slab_to_nchw(y, meta):
    """Lazy crop of slab layout to (N, Cout, Ho, Wo); fuses into the consumer."""
    Cout, Ho, Wo, Wph = meta
    N = y.shape[0]
    return y[:, :Cout, :Ho * Wph].reshape(N, Cout, Ho, Wph)[:, :, :, :Wo]


# ----------------------------------------------------------------------------
# Parameters (PyTorch Conv2d-style init, OIHW weight layout)
# ----------------------------------------------------------------------------
def _conv_init(key, cin, cout, bias=True):
    k1, k2 = jax.random.split(key)
    bound = 1.0 / math.sqrt(cin * 16)
    w = jax.random.uniform(k1, (cout, cin, 4, 4), jnp.float32, -bound, bound)
    b = jax.random.uniform(k2, (cout,), jnp.float32, -bound, bound) if bias else None
    return {"w": w, "b": b}


def init_params(key, input_dim, output_dim, channel, num_depth):
    blocks = []
    ch = channel
    key, k = jax.random.split(key)
    blocks.append(_conv_init(k, input_dim, ch, bias=True))          # conv + LeakyReLU
    for _ in range(num_depth - 1):
        key, k = jax.random.split(key)
        blocks.append(_conv_init(k, ch, ch * 2, bias=True))         # DiscriminateBlock
        ch *= 2
    key, k = jax.random.split(key)
    blocks.append(_conv_init(k, ch, output_dim, bias=False))        # ZeroPad + conv
    return {"blocks": blocks}


# ----------------------------------------------------------------------------
# Full Discriminator forward
# ----------------------------------------------------------------------------
def discriminator_forward(params, x, target):
    # forward(x, target): result = cat((x, target), dim=1) then the block chain
    r = jnp.concatenate([x, target], axis=1)
    blocks = params["blocks"]

    # block 0: Conv2d(k4,s2,p1) + LeakyReLU(0.2)          (no InstanceNorm)
    y, meta = conv4x4_s2_block(r, blocks[0]["w"], blocks[0]["b"],
                               pads=(1, 1, 1, 1), do_in=False, do_act=True,
                               use_bias=True, out_dtype=MATMUL_DTYPE)

    # middle blocks: Conv2d(k4,s2,p1) + InstanceNorm2d + LeakyReLU(0.2)
    # (conv bias is exactly cancelled by the affine-less InstanceNorm -> skipped)
    for blk in blocks[1:-1]:
        y, meta = conv4x4_s2_block(slab_to_nchw(y, meta), blk["w"], None,
                                   pads=(1, 1, 1, 1), do_in=True, do_act=True,
                                   use_bias=False, out_dtype=MATMUL_DTYPE)

    # final: ZeroPad2d((1,0,1,0)) + Conv2d(k4,s2,p1, bias=False)
    # -> total zero pad (top, bottom, left, right) = (2, 1, 2, 1); f32 output
    y, meta = conv4x4_s2_block(slab_to_nchw(y, meta), blocks[-1]["w"], None,
                               pads=(2, 1, 2, 1), do_in=False, do_act=False,
                               use_bias=False, out_dtype=jnp.float32)
    return slab_to_nchw(y, meta)


# ----------------------------------------------------------------------------
# Pure-JAX reference (for correctness check)
# ----------------------------------------------------------------------------
def discriminator_reference(params, x, target):
    r = jnp.concatenate([x, target], axis=1).astype(jnp.float32)
    blocks = params["blocks"]

    def conv(r, w, b, pads):
        rp = jnp.pad(r, ((0, 0), (0, 0), (pads[0], pads[1]), (pads[2], pads[3])))
        z = lax.conv_general_dilated(rp, w, (2, 2), "VALID",
                                     dimension_numbers=("NCHW", "OIHW", "NCHW"),
                                     precision=lax.Precision.HIGHEST)
        if b is not None:
            z = z + b[None, :, None, None]
        return z

    z = conv(r, blocks[0]["w"], blocks[0]["b"], (1, 1, 1, 1))
    r = jnp.where(z >= 0, z, NEG_SLOPE * z)
    for blk in blocks[1:-1]:
        z = conv(r, blk["w"], blk["b"], (1, 1, 1, 1))
        mean = jnp.mean(z, axis=(2, 3), keepdims=True)
        var = jnp.mean(jnp.square(z - mean), axis=(2, 3), keepdims=True)
        z = (z - mean) * lax.rsqrt(var + EPS)
        r = jnp.where(z >= 0, z, NEG_SLOPE * z)
    return conv(r, blocks[-1]["w"], None, (2, 1, 2, 1))


if __name__ == "__main__":
    input_dim, output_dim, channel, num_depth = 4, 1, 4, 2
    key = jax.random.PRNGKey(0)
    pkey, xkey, tkey = jax.random.split(key, 3)
    params = init_params(pkey, input_dim, output_dim, channel, num_depth)

    # x and target are concatenated along channels to form input_dim channels
    x = jax.random.normal(xkey, (2, input_dim // 2, 16, 16), jnp.float32)
    target = jax.random.normal(tkey, (2, input_dim - input_dim // 2, 16, 16), jnp.float32)

    fwd = jax.jit(discriminator_forward)
    out = fwd(params, x, target)
    jax.block_until_ready(out)

    assert out.shape == (2, output_dim, 2, 2), out.shape
    assert bool(jnp.all(jnp.isfinite(out)))

    # NOTE: bf16 operands with f32 accumulation; re-validate this tolerance at
    # real channel counts (K up to ~2048) before production use.
    ref = discriminator_reference(params, x, target)
    err = float(jnp.max(jnp.abs(out - ref)))
    assert err < 1e-1, f"max abs err vs reference: {err}"
    print("KERNEL_OK")
</pallas_src>

<mosaic_0001>
module attributes {stable_mosaic.version = 11 : i64} {
  func.func @kernel(%arg0: i32, %arg1: i32, %arg2: memref<1x16x128xbf16, #tpu.memory_space<vmem>>, %arg3: memref<4x16x16xbf16, #tpu.memory_space<vmem>>, %arg4: memref<16x1xf32, #tpu.memory_space<vmem>>, %arg5: memref<1x16x128xbf16, #tpu.memory_space<vmem>>, %arg6: memref<16x128xf32, #tpu.memory_space<vmem>>) attributes {dimension_semantics = [#tpu.dimension_semantics<parallel>, #tpu.dimension_semantics<parallel>], iteration_bounds = array<i64: 2, 1>, scalar_prefetch = 0 : i64, scratch_operands = 1 : i64, tpu.core_type = #tpu.core_type<tc>, window_params = [{transform_indices = @transform_0, window_bounds = array<i64: 1, 16, 128>}, {transform_indices = @transform_1, window_bounds = array<i64: 4, 16, 16>}, {transform_indices = @transform_2, window_bounds = array<i64: 16, 1>}, {transform_indices = @transform_3, window_bounds = array<i64: 1, 16, 128>}]} {
    %c0 = arith.constant 0 : index
    %c0_0 = arith.constant 0 : index
    %c0_1 = arith.constant 0 : index
    %0 = vector.load %arg2[%c0, %c0_0, %c0_1] : memref<1x16x128xbf16, #tpu.memory_space<vmem>>, vector<1x16x128xbf16>
    %1 = vector.shape_cast %0 : vector<1x16x128xbf16> to vector<16x128xbf16>
    %c0_2 = arith.constant 0 : index
    %c0_3 = arith.constant 0 : index
    %c0_4 = arith.constant 0 : index
    %2 = vector.load %arg3[%c0_2, %c0_3, %c0_4] : memref<4x16x16xbf16, #tpu.memory_space<vmem>>, vector<1x16x16xbf16>
    %3 = vector.shape_cast %2 : vector<1x16x16xbf16> to vector<16x16xbf16>
    %cst = arith.constant dense<0.000000e+00> : vector<16x128xf32>
    %4 = tpu.matmul %3, %1, %cst {dimension_numbers = #tpu.dot_dimension_numbers<[1], [0], [0], [1], [0, 0, 1, 1], [], []>} : vector<16x16xbf16>, vector<16x128xbf16>, vector<16x128xf32> -> vector<16x128xf32>
    %c0_5 = arith.constant 0 : index
    %c0_6 = arith.constant 0 : index
    %5 = vector.load %arg6[%c0_5, %c0_6] : memref<16x128xf32, #tpu.memory_space<vmem>>, vector<16x128xf32>
    tpu.vector_store %arg6[%c0_5, %c0_6], %4 {strides = array<i32>} : memref<16x128xf32, #tpu.memory_space<vmem>>, vector<16x128xf32>,
    %c1 = arith.constant 1 : index
    %c0_7 = arith.constant 0 : index
    %c0_8 = arith.constant 0 : index
    %6 = vector.load %arg3[%c1, %c0_7, %c0_8] : memref<4x16x16xbf16, #tpu.memory_space<vmem>>, vector<1x16x16xbf16>
    %7 = vector.shape_cast %6 : vector<1x16x16xbf16> to vector<16x16xbf16>
    %cst_9 = arith.constant dense<0.000000e+00> : vector<16x128xf32>
    %8 = tpu.matmul %7, %1, %cst_9 {dimension_numbers = #tpu.dot_dimension_numbers<[1], [0], [0], [1], [0, 0, 1, 1], [], []>} : vector<16x16xbf16>, vector<16x128xbf16>, vector<16x128xf32> -> vector<16x128xf32>
    %c127_i32 = arith.constant 127 : i32
    %9 = tpu.dynamic_rotate %8 by %c127_i32 dim 1 : vector<16x128xf32>, i32 -> vector<16x128xf32>
    %c0_10 = arith.constant 0 : index
    %c0_11 = arith.constant 0 : index
    %10 = vector.load %arg6[%c0_10, %c0_11] : memref<16x128xf32, #tpu.memory_space<vmem>>, vector<16x128xf32>
    %11 = arith.addf %10, %9 : vector<16x128xf32>
    %c0_12 = arith.constant 0 : index
    %c0_13 = arith.constant 0 : index
    %12 = vector.load %arg6[%c0_12, %c0_13] : memref<16x128xf32, #tpu.memory_space<vmem>>, vector<16x128xf32>
    tpu.vector_store %arg6[%c0_12, %c0_13], %11 {strides = array<i32>} : memref<16x128xf32, #tpu.memory_space<vmem>>, vector<16x128xf32>,
    %c2 = arith.constant 2 : index
    %c0_14 = arith.constant 0 : index
    %c0_15 = arith.constant 0 : index
    %13 = vector.load %arg3[%c2, %c0_14, %c0_15] : memref<4x16x16xbf16, #tpu.memory_space<vmem>>, vector<1x16x16xbf16>
    %14 = vector.shape_cast %13 : vector<1x16x16xbf16> to vector<16x16xbf16>
    %cst_16 = arith.constant dense<0.000000e+00> : vector<16x128xf32>
    %15 = tpu.matmul %14, %1, %cst_16 {dimension_numbers = #tpu.dot_dimension_numbers<[1], [0], [0], [1], [0, 0, 1, 1], [], []>} : vector<16x16xbf16>, vector<16x128xbf16>, vector<16x128xf32> -> vector<16x128xf32>
    %c119_i32 = arith.constant 119 : i32
    %16 = tpu.dynamic_rotate %15 by %c119_i32 dim 1 : vector<16x128xf32>, i32 -> vector<16x128xf32>
    %c0_17 = arith.constant 0 : index
    %c0_18 = arith.constant 0 : index
    %17 = vector.load %arg6[%c0_17, %c0_18] : memref<16x128xf32, #tpu.memory_space<vmem>>, vector<16x128xf32>
    %18 = arith.addf %17, %16 : vector<16x128xf32>
    %c0_19 = arith.constant 0 : index
    %c0_20 = arith.constant 0 : index
    %19 = vector.load %arg6[%c0_19, %c0_20] : memref<16x128xf32, #tpu.memory_space<vmem>>, vector<16x128xf32>
    tpu.vector_store %arg6[%c0_19, %c0_20], %18 {strides = array<i32>} : memref<16x128xf32, #tpu.memory_space<vmem>>, vector<16x128xf32>,
    %c3 = arith.constant 3 : index
    %c0_21 = arith.constant 0 : index
    %c0_22 = arith.constant 0 : index
    %20 = vector.load %arg3[%c3, %c0_21, %c0_22] : memref<4x16x16xbf16, #tpu.memory_space<vmem>>, vector<1x16x16xbf16>
    %21 = vector.shape_cast %20 : vector<1x16x16xbf16> to vector<16x16xbf16>
    %cst_23 = arith.constant dense<0.000000e+00> : vector<16x128xf32>
    %22 = tpu.matmul %21, %1, %cst_23 {dimension_numbers = #tpu.dot_dimension_numbers<[1], [0], [0], [1], [0, 0, 1, 1], [], []>} : vector<16x16xbf16>, vector<16x128xbf16>, vector<16x128xf32> -> vector<16x128xf32>
    %c118_i32 = arith.constant 118 : i32
    %23 = tpu.dynamic_rotate %22 by %c118_i32 dim 1 : vector<16x128xf32>, i32 -> vector<16x128xf32>
    %c0_24 = arith.constant 0 : index
    %c0_25 = arith.constant 0 : index
    %24 = vector.load %arg6[%c0_24, %c0_25] : memref<16x128xf32, #tpu.memory_space<vmem>>, vector<16x128xf32>
    %25 = arith.addf %24, %23 : vector<16x128xf32>
    %c0_26 = arith.constant 0 : index
    %c0_27 = arith.constant 0 : index
    %26 = vector.load %arg6[%c0_26, %c0_27] : memref<16x128xf32, #tpu.memory_space<vmem>>, vector<16x128xf32>
    tpu.vector_store %arg6[%c0_26, %c0_27], %25 {strides = array<i32>} : memref<16x128xf32, #tpu.memory_space<vmem>>, vector<16x128xf32>,
    %c0_28 = arith.constant 0 : index
    %c0_29 = arith.constant 0 : index
    %27 = vector.load %arg6[%c0_28, %c0_29] : memref<16x128xf32, #tpu.memory_space<vmem>>, vector<16x128xf32>
    %c0_30 = arith.constant 0 : index
    %c0_31 = arith.constant 0 : index
    %28 = vector.load %arg4[%c0_30, %c0_31] : memref<16x1xf32, #tpu.memory_space<vmem>>, vector<16x1xf32>
    %29 = vector.broadcast %28 : vector<16x1xf32> to vector<16x128xf32>
    %30 = arith.addf %27, %29 : vector<16x128xf32>
    %cst_32 = arith.constant 0.000000e+00 : f32
    %31 = vector.broadcast %cst_32 : f32 to vector<16x128xf32>
    %32 = arith.cmpf oge, %30, %31 : vector<16x128xf32>
    %cst_33 = arith.constant 2.000000e-01 : f32
    %33 = vector.broadcast %cst_33 : f32 to vector<16x128xf32>
    %34 = arith.mulf %33, %30 : vector<16x128xf32>
    %35 = arith.select %32, %30, %34 : vector<16x128xi1>, vector<16x128xf32>
    %36 = arith.truncf %35 : vector<16x128xf32> to vector<16x128xbf16>
    %c0_34 = arith.constant 0 : index
    %c0_35 = arith.constant 0 : index
    %c0_36 = arith.constant 0 : index
    %37 = vector.load %arg5[%c0_34, %c0_35, %c0_36] : memref<1x16x128xbf16, #tpu.memory_space<vmem>>, vector<1x16x128xbf16>
    %38 = vector.shape_cast %37 : vector<1x16x128xbf16> to vector<16x128xbf16>
    %39 = vector.shape_cast %36 : vector<16x128xbf16> to vector<1x16x128xbf16>
    tpu.vector_store %arg5[%c0_34, %c0_35, %c0_36], %39 {strides = array<i32>} : memref<1x16x128xbf16, #tpu.memory_space<vmem>>, vector<1x16x128xbf16>,
    return
  }
  func.func @transform_0(%arg0: i32, %arg1: i32) -> (i32, i32, i32) {
    %c0_i32 = arith.constant 0 : i32
    %c0_i32_0 = arith.constant 0 : i32
    %c0_i32_1 = arith.constant 0 : i32
    return %arg0, %c0_i32, %c0_i32_0 : i32, i32, i32
  }
  func.func @transform_1(%arg0: i32, %arg1: i32) -> (i32, i32, i32) {
    %c0_i32 = arith.constant 0 : i32
    %c0_i32_0 = arith.constant 0 : i32
    %c0_i32_1 = arith.constant 0 : i32
    return %c0_i32, %arg1, %c0_i32_0 : i32, i32, i32
  }
  func.func @transform_2(%arg0: i32, %arg1: i32) -> (i32, i32) {
    %c0_i32 = arith.constant 0 : i32
    %c0_i32_0 = arith.constant 0 : i32
    return %arg1, %c0_i32 : i32, i32
  }
  func.func @transform_3(%arg0: i32, %arg1: i32) -> (i32, i32, i32) {
    %c0_i32 = arith.constant 0 : i32
    %c0_i32_0 = arith.constant 0 : i32
    return %arg0, %arg1, %c0_i32 : i32, i32, i32
  }
}

module attributes {stable_mosaic.version = 11 : i64} {
  func.func @kernel(%arg0: i32, %arg1: i32, %arg2: memref<1x16x128xbf16, #tpu.memory_space<vmem>>, %arg3: memref<4x16x16xbf16, #tpu.memory_space<vmem>>, %arg4: memref<16x1xf32, #tpu.memory_space<vmem>>, %arg5: memref<1x16x128xbf16, #tpu.memory_space<vmem>>, %arg6: memref<16x128xf32, #tpu.memory_space<vmem>>) attributes {dimension_semantics = [#tpu.dimension_semantics<parallel>, #tpu.dimension_semantics<parallel>], iteration_bounds = array<i64: 2, 1>, scalar_prefetch = 0 : i64, scratch_operands = 1 : i64, tpu.core_type = #tpu.core_type<tc>, window_params = [{transform_indices = @transform_0, window_bounds = array<i64: 1, 16, 128>}, {transform_indices = @transform_1, window_bounds = array<i64: 4, 16, 16>}, {transform_indices = @transform_2, window_bounds = array<i64: 16, 1>}, {transform_indices = @transform_3, window_bounds = array<i64: 1, 16, 128>}]} {
    %c0 = arith.constant 0 : index
    %c0_0 = arith.constant 0 : index
    %c0_1 = arith.constant 0 : index
    %0 = vector.load %arg2[%c0, %c0_0, %c0_1] : memref<1x16x128xbf16, #tpu.memory_space<vmem>>, vector<1x16x128xbf16>
    %1 = vector.shape_cast %0 : vector<1x16x128xbf16> to vector<16x128xbf16>
    %c0_2 = arith.constant 0 : index
    %c0_3 = arith.constant 0 : index
    %c0_4 = arith.constant 0 : index
    %2 = vector.load %arg3[%c0_2, %c0_3, %c0_4] : memref<4x16x16xbf16, #tpu.memory_space<vmem>>, vector<1x16x16xbf16>
    %3 = vector.shape_cast %2 : vector<1x16x16xbf16> to vector<16x16xbf16>
    %cst = arith.constant dense<0.000000e+00> : vector<16x128xf32>
    %4 = tpu.matmul %3, %1, %cst {dimension_numbers = #tpu.dot_dimension_numbers<[1], [0], [0], [1], [0, 0, 1, 1], [], []>} : vector<16x16xbf16>, vector<16x128xbf16>, vector<16x128xf32> -> vector<16x128xf32>
    %c0_5 = arith.constant 0 : index
    %c0_6 = arith.constant 0 : index
    %5 = vector.load %arg6[%c0_5, %c0_6] : memref<16x128xf32, #tpu.memory_space<vmem>>, vector<16x128xf32>
    tpu.vector_store %arg6[%c0_5, %c0_6], %4 {strides = array<i32>} : memref<16x128xf32, #tpu.memory_space<vmem>>, vector<16x128xf32>,
    %c1 = arith.constant 1 : index
    %c0_7 = arith.constant 0 : index
    %c0_8 = arith.constant 0 : index
    %6 = vector.load %arg3[%c1, %c0_7, %c0_8] : memref<4x16x16xbf16, #tpu.memory_space<vmem>>, vector<1x16x16xbf16>
    %7 = vector.shape_cast %6 : vector<1x16x16xbf16> to vector<16x16xbf16>
    %cst_9 = arith.constant dense<0.000000e+00> : vector<16x128xf32>
    %8 = tpu.matmul %7, %1, %cst_9 {dimension_numbers = #tpu.dot_dimension_numbers<[1], [0], [0], [1], [0, 0, 1, 1], [], []>} : vector<16x16xbf16>, vector<16x128xbf16>, vector<16x128xf32> -> vector<16x128xf32>
    %c127_i32 = arith.constant 127 : i32
    %9 = tpu.dynamic_rotate %8 by %c127_i32 dim 1 : vector<16x128xf32>, i32 -> vector<16x128xf32>
    %c0_10 = arith.constant 0 : index
    %c0_11 = arith.constant 0 : index
    %10 = vector.load %arg6[%c0_10, %c0_11] : memref<16x128xf32, #tpu.memory_space<vmem>>, vector<16x128xf32>
    %11 = arith.addf %10, %9 : vector<16x128xf32>
    %c0_12 = arith.constant 0 : index
    %c0_13 = arith.constant 0 : index
    %12 = vector.load %arg6[%c0_12, %c0_13] : memref<16x128xf32, #tpu.memory_space<vmem>>, vector<16x128xf32>
    tpu.vector_store %arg6[%c0_12, %c0_13], %11 {strides = array<i32>} : memref<16x128xf32, #tpu.memory_space<vmem>>, vector<16x128xf32>,
    %c2 = arith.constant 2 : index
    %c0_14 = arith.constant 0 : index
    %c0_15 = arith.constant 0 : index
    %13 = vector.load %arg3[%c2, %c0_14, %c0_15] : memref<4x16x16xbf16, #tpu.memory_space<vmem>>, vector<1x16x16xbf16>
    %14 = vector.shape_cast %13 : vector<1x16x16xbf16> to vector<16x16xbf16>
    %cst_16 = arith.constant dense<0.000000e+00> : vector<16x128xf32>
    %15 = tpu.matmul %14, %1, %cst_16 {dimension_numbers = #tpu.dot_dimension_numbers<[1], [0], [0], [1], [0, 0, 1, 1], [], []>} : vector<16x16xbf16>, vector<16x128xbf16>, vector<16x128xf32> -> vector<16x128xf32>
    %c123_i32 = arith.constant 123 : i32
    %16 = tpu.dynamic_rotate %15 by %c123_i32 dim 1 : vector<16x128xf32>, i32 -> vector<16x128xf32>
    %c0_17 = arith.constant 0 : index
    %c0_18 = arith.constant 0 : index
    %17 = vector.load %arg6[%c0_17, %c0_18] : memref<16x128xf32, #tpu.memory_space<vmem>>, vector<16x128xf32>
    %18 = arith.addf %17, %16 : vector<16x128xf32>
    %c0_19 = arith.constant 0 : index
    %c0_20 = arith.constant 0 : index
    %19 = vector.load %arg6[%c0_19, %c0_20] : memref<16x128xf32, #tpu.memory_space<vmem>>, vector<16x128xf32>
    tpu.vector_store %arg6[%c0_19, %c0_20], %18 {strides = array<i32>} : memref<16x128xf32, #tpu.memory_space<vmem>>, vector<16x128xf32>,
    %c3 = arith.constant 3 : index
    %c0_21 = arith.constant 0 : index
    %c0_22 = arith.constant 0 : index
    %20 = vector.load %arg3[%c3, %c0_21, %c0_22] : memref<4x16x16xbf16, #tpu.memory_space<vmem>>, vector<1x16x16xbf16>
    %21 = vector.shape_cast %20 : vector<1x16x16xbf16> to vector<16x16xbf16>
    %cst_23 = arith.constant dense<0.000000e+00> : vector<16x128xf32>
    %22 = tpu.matmul %21, %1, %cst_23 {dimension_numbers = #tpu.dot_dimension_numbers<[1], [0], [0], [1], [0, 0, 1, 1], [], []>} : vector<16x16xbf16>, vector<16x128xbf16>, vector<16x128xf32> -> vector<16x128xf32>
    %c122_i32 = arith.constant 122 : i32
    %23 = tpu.dynamic_rotate %22 by %c122_i32 dim 1 : vector<16x128xf32>, i32 -> vector<16x128xf32>
    %c0_24 = arith.constant 0 : index
    %c0_25 = arith.constant 0 : index
    %24 = vector.load %arg6[%c0_24, %c0_25] : memref<16x128xf32, #tpu.memory_space<vmem>>, vector<16x128xf32>
    %25 = arith.addf %24, %23 : vector<16x128xf32>
    %c0_26 = arith.constant 0 : index
    %c0_27 = arith.constant 0 : index
    %26 = vector.load %arg6[%c0_26, %c0_27] : memref<16x128xf32, #tpu.memory_space<vmem>>, vector<16x128xf32>
    tpu.vector_store %arg6[%c0_26, %c0_27], %25 {strides = array<i32>} : memref<16x128xf32, #tpu.memory_space<vmem>>, vector<16x128xf32>,
    %c0_28 = arith.constant 0 : index
    %c0_29 = arith.constant 0 : index
    %27 = vector.load %arg6[%c0_28, %c0_29] : memref<16x128xf32, #tpu.memory_space<vmem>>, vector<16x128xf32>
    %28 = tpu.iota {dimensions = array<i32: 1>} : vector<1x128xi32>
    %29 = arith.sitofp %28 : vector<1x128xi32> to vector<1x128xf32>
    %cst_30 = arith.constant 5.000000e-01 : f32
    %30 = vector.broadcast %cst_30 : f32 to vector<1x128xf32>
    %31 = arith.addf %29, %30 : vector<1x128xf32>
    %cst_31 = arith.constant 2.000000e-01 : f32
    %32 = vector.broadcast %cst_31 : f32 to vector<1x128xf32>
    %33 = arith.mulf %31, %32 : vector<1x128xf32>
    %34 = math.floor %33 : vector<1x128xf32>
    %cst_32 = arith.constant 5.000000e+00 : f32
    %35 = vector.broadcast %cst_32 : f32 to vector<1x128xf32>
    %36 = arith.mulf %34, %35 : vector<1x128xf32>
    %37 = arith.subf %29, %36 : vector<1x128xf32>
    %cst_33 = arith.constant 2.000000e+01 : f32
    %38 = vector.broadcast %cst_33 : f32 to vector<1x128xf32>
    %39 = arith.cmpf olt, %29, %38 : vector<1x128xf32>
    %cst_34 = arith.constant 4.000000e+00 : f32
    %40 = vector.broadcast %cst_34 : f32 to vector<1x128xf32>
    %41 = arith.cmpf olt, %37, %40 : vector<1x128xf32>
    %42 = arith.andi %39, %41 : vector<1x128xi1>
    %43 = arith.extui %42 : vector<1x128xi1> to vector<1x128xi32>
    %44 = arith.sitofp %43 : vector<1x128xi32> to vector<1x128xf32>
    %45 = vector.broadcast %44 : vector<1x128xf32> to vector<16x128xf32>
    %46 = arith.mulf %27, %45 : vector<16x128xf32>
    %cst_35 = arith.constant dense<0.000000e+00> : vector<16xf32>
    %47 = vector.multi_reduction <add>, %46, %cst_35 [1] : vector<16x128xf32> to vector<16xf32>
    %48 = vector.shape_cast %47 : vector<16xf32> to vector<16x1xf32>
    %cst_36 = arith.constant 6.250000e-02 : f32
    %49 = vector.broadcast %cst_36 : f32 to vector<16x1xf32>
    %50 = arith.mulf %48, %49 : vector<16x1xf32>
    %51 = arith.mulf %46, %27 : vector<16x128xf32>
    %cst_37 = arith.constant dense<0.000000e+00> : vector<16xf32>
    %52 = vector.multi_reduction <add>, %51, %cst_37 [1] : vector<16x128xf32> to vector<16xf32>
    %53 = vector.shape_cast %52 : vector<16xf32> to vector<16x1xf32>
    %cst_38 = arith.constant 6.250000e-02 : f32
    %54 = vector.broadcast %cst_38 : f32 to vector<16x1xf32>
    %55 = arith.mulf %53, %54 : vector<16x1xf32>
    %56 = arith.mulf %50, %50 : vector<16x1xf32>
    %57 = arith.subf %55, %56 : vector<16x1xf32>
    %cst_39 = arith.constant 0.000000e+00 : f32
    %58 = vector.broadcast %cst_39 : f32 to vector<16x1xf32>
    %59 = arith.maximumf %57, %58 : vector<16x1xf32>
    %60 = vector.broadcast %50 : vector<16x1xf32> to vector<16x128xf32>
    %61 = arith.subf %27, %60 : vector<16x128xf32>
    %cst_40 = arith.constant 9.99999974E-6 : f32
    %62 = vector.broadcast %cst_40 : f32 to vector<16x1xf32>
    %63 = arith.addf %59, %62 : vector<16x1xf32>
    %64 = math.rsqrt %63 : vector<16x1xf32>
    %65 = vector.broadcast %64 : vector<16x1xf32> to vector<16x128xf32>
    %66 = arith.mulf %61, %65 : vector<16x128xf32>
    %cst_41 = arith.constant 0.000000e+00 : f32
    %67 = vector.broadcast %cst_41 : f32 to vector<16x128xf32>
    %68 = arith.cmpf oge, %66, %67 : vector<16x128xf32>
    %cst_42 = arith.constant 2.000000e-01 : f32
    %69 = vector.broadcast %cst_42 : f32 to vector<16x128xf32>
    %70 = arith.mulf %69, %66 : vector<16x128xf32>
    %71 = arith.select %68, %66, %70 : vector<16x128xi1>, vector<16x128xf32>
    %72 = arith.truncf %71 : vector<16x128xf32> to vector<16x128xbf16>
    %c0_43 = arith.constant 0 : index
    %c0_44 = arith.constant 0 : index
    %c0_45 = arith.constant 0 : index
    %73 = vector.load %arg5[%c0_43, %c0_44, %c0_45] : memref<1x16x128xbf16, #tpu.memory_space<vmem>>, vector<1x16x128xbf16>
    %74 = vector.shape_cast %73 : vector<1x16x128xbf16> to vector<16x128xbf16>
    %75 = vector.shape_cast %72 : vector<16x128xbf16> to vector<1x16x128xbf16>
    tpu.vector_store %arg5[%c0_43, %c0_44, %c0_45], %75 {strides = array<i32>} : memref<1x16x128xbf16, #tpu.memory_space<vmem>>, vector<1x16x128xbf16>,
    return
  }
  func.func @transform_0(%arg0: i32, %arg1: i32) -> (i32, i32, i32) {
    %c0_i32 = arith.constant 0 : i32
    %c0_i32_0 = arith.constant 0 : i32
    %c0_i32_1 = arith.constant 0 : i32
    return %arg0, %c0_i32, %c0_i32_0 : i32, i32, i32
  }
  func.func @transform_1(%arg0: i32, %arg1: i32) -> (i32, i32, i32) {
    %c0_i32 = arith.constant 0 : i32
    %c0_i32_0 = arith.constant 0 : i32
    %c0_i32_1 = arith.constant 0 : i32
    return %c0_i32, %arg1, %c0_i32_0 : i32, i32, i32
  }
  func.func @transform_2(%arg0: i32, %arg1: i32) -> (i32, i32) {
    %c0_i32 = arith.constant 0 : i32
    %c0_i32_0 = arith.constant 0 : i32
    return %arg1, %c0_i32 : i32, i32
  }
  func.func @transform_3(%arg0: i32, %arg1: i32) -> (i32, i32, i32) {
    %c0_i32 = arith.constant 0 : i32
    %c0_i32_0 = arith.constant 0 : i32
    return %arg0, %arg1, %c0_i32 : i32, i32, i32
  }
}

module attributes {stable_mosaic.version = 11 : i64} {
  func.func @kernel(%arg0: i32, %arg1: i32, %arg2: memref<1x32x128xbf16, #tpu.memory_space<vmem>>, %arg3: memref<4x16x32xbf16, #tpu.memory_space<vmem>>, %arg4: memref<16x1xf32, #tpu.memory_space<vmem>>, %arg5: memref<1x16x128xf32, #tpu.memory_space<vmem>>, %arg6: memref<16x128xf32, #tpu.memory_space<vmem>>) attributes {dimension_semantics = [#tpu.dimension_semantics<parallel>, #tpu.dimension_semantics<parallel>], iteration_bounds = array<i64: 2, 1>, scalar_prefetch = 0 : i64, scratch_operands = 1 : i64, tpu.core_type = #tpu.core_type<tc>, window_params = [{transform_indices = @transform_0, window_bounds = array<i64: 1, 32, 128>}, {transform_indices = @transform_1, window_bounds = array<i64: 4, 16, 32>}, {transform_indices = @transform_2, window_bounds = array<i64: 16, 1>}, {transform_indices = @transform_3, window_bounds = array<i64: 1, 16, 128>}]} {
    %c0 = arith.constant 0 : index
    %c0_0 = arith.constant 0 : index
    %c0_1 = arith.constant 0 : index
    %0 = vector.load %arg2[%c0, %c0_0, %c0_1] : memref<1x32x128xbf16, #tpu.memory_space<vmem>>, vector<1x32x128xbf16>
    %1 = vector.shape_cast %0 : vector<1x32x128xbf16> to vector<32x128xbf16>
    %c0_2 = arith.constant 0 : index
    %c0_3 = arith.constant 0 : index
    %c0_4 = arith.constant 0 : index
    %2 = vector.load %arg3[%c0_2, %c0_3, %c0_4] : memref<4x16x32xbf16, #tpu.memory_space<vmem>>, vector<1x16x32xbf16>
    %3 = vector.shape_cast %2 : vector<1x16x32xbf16> to vector<16x32xbf16>
    %cst = arith.constant dense<0.000000e+00> : vector<16x128xf32>
    %4 = tpu.matmul %3, %1, %cst {dimension_numbers = #tpu.dot_dimension_numbers<[1], [0], [0], [1], [0, 0, 1, 1], [], []>} : vector<16x32xbf16>, vector<32x128xbf16>, vector<16x128xf32> -> vector<16x128xf32>
    %c0_5 = arith.constant 0 : index
    %c0_6 = arith.constant 0 : index
    %5 = vector.load %arg6[%c0_5, %c0_6] : memref<16x128xf32, #tpu.memory_space<vmem>>, vector<16x128xf32>
    tpu.vector_store %arg6[%c0_5, %c0_6], %4 {strides = array<i32>} : memref<16x128xf32, #tpu.memory_space<vmem>>, vector<16x128xf32>,
    %c1 = arith.constant 1 : index
    %c0_7 = arith.constant 0 : index
    %c0_8 = arith.constant 0 : index
    %6 = vector.load %arg3[%c1, %c0_7, %c0_8] : memref<4x16x32xbf16, #tpu.memory_space<vmem>>, vector<1x16x32xbf16>
    %7 = vector.shape_cast %6 : vector<1x16x32xbf16> to vector<16x32xbf16>
    %cst_9 = arith.constant dense<0.000000e+00> : vector<16x128xf32>
    %8 = tpu.matmul %7, %1, %cst_9 {dimension_numbers = #tpu.dot_dimension_numbers<[1], [0], [0], [1], [0, 0, 1, 1], [], []>} : vector<16x32xbf16>, vector<32x128xbf16>, vector<16x128xf32> -> vector<16x128xf32>
    %c127_i32 = arith.constant 127 : i32
    %9 = tpu.dynamic_rotate %8 by %c127_i32 dim 1 : vector<16x128xf32>, i32 -> vector<16x128xf32>
    %c0_10 = arith.constant 0 : index
    %c0_11 = arith.constant 0 : index
    %10 = vector.load %arg6[%c0_10, %c0_11] : memref<16x128xf32, #tpu.memory_space<vmem>>, vector<16x128xf32>
    %11 = arith.addf %10, %9 : vector<16x128xf32>
    %c0_12 = arith.constant 0 : index
    %c0_13 = arith.constant 0 : index
    %12 = vector.load %arg6[%c0_12, %c0_13] : memref<16x128xf32, #tpu.memory_space<vmem>>, vector<16x128xf32>
    tpu.vector_store %arg6[%c0_12, %c0_13], %11 {strides = array<i32>} : memref<16x128xf32, #tpu.memory_space<vmem>>, vector<16x128xf32>,
    %c2 = arith.constant 2 : index
    %c0_14 = arith.constant 0 : index
    %c0_15 = arith.constant 0 : index
    %13 = vector.load %arg3[%c2, %c0_14, %c0_15] : memref<4x16x32xbf16, #tpu.memory_space<vmem>>, vector<1x16x32xbf16>
    %14 = vector.shape_cast %13 : vector<1x16x32xbf16> to vector<16x32xbf16>
    %cst_16 = arith.constant dense<0.000000e+00> : vector<16x128xf32>
    %15 = tpu.matmul %14, %1, %cst_16 {dimension_numbers = #tpu.dot_dimension_numbers<[1], [0], [0], [1], [0, 0, 1, 1], [], []>} : vector<16x32xbf16>, vector<32x128xbf16>, vector<16x128xf32> -> vector<16x128xf32>
    %c125_i32 = arith.constant 125 : i32
    %16 = tpu.dynamic_rotate %15 by %c125_i32 dim 1 : vector<16x128xf32>, i32 -> vector<16x128xf32>
    %c0_17 = arith.constant 0 : index
    %c0_18 = arith.constant 0 : index
    %17 = vector.load %arg6[%c0_17, %c0_18] : memref<16x128xf32, #tpu.memory_space<vmem>>, vector<16x128xf32>
    %18 = arith.addf %17, %16 : vector<16x128xf32>
    %c0_19 = arith.constant 0 : index
    %c0_20 = arith.constant 0 : index
    %19 = vector.load %arg6[%c0_19, %c0_20] : memref<16x128xf32, #tpu.memory_space<vmem>>, vector<16x128xf32>
    tpu.vector_store %arg6[%c0_19, %c0_20], %18 {strides = array<i32>} : memref<16x128xf32, #tpu.memory_space<vmem>>, vector<16x128xf32>,
    %c3 = arith.constant 3 : index
    %c0_21 = arith.constant 0 : index
    %c0_22 = arith.constant 0 : index
    %20 = vector.load %arg3[%c3, %c0_21, %c0_22] : memref<4x16x32xbf16, #tpu.memory_space<vmem>>, vector<1x16x32xbf16>
    %21 = vector.shape_cast %20 : vector<1x16x32xbf16> to vector<16x32xbf16>
    %cst_23 = arith.constant dense<0.000000e+00> : vector<16x128xf32>
    %22 = tpu.matmul %21, %1, %cst_23 {dimension_numbers = #tpu.dot_dimension_numbers<[1], [0], [0], [1], [0, 0, 1, 1], [], []>} : vector<16x32xbf16>, vector<32x128xbf16>, vector<16x128xf32> -> vector<16x128xf32>
    %c124_i32 = arith.constant 124 : i32
    %23 = tpu.dynamic_rotate %22 by %c124_i32 dim 1 : vector<16x128xf32>, i32 -> vector<16x128xf32>
    %c0_24 = arith.constant 0 : index
    %c0_25 = arith.constant 0 : index
    %24 = vector.load %arg6[%c0_24, %c0_25] : memref<16x128xf32, #tpu.memory_space<vmem>>, vector<16x128xf32>
    %25 = arith.addf %24, %23 : vector<16x128xf32>
    %c0_26 = arith.constant 0 : index
    %c0_27 = arith.constant 0 : index
    %26 = vector.load %arg6[%c0_26, %c0_27] : memref<16x128xf32, #tpu.memory_space<vmem>>, vector<16x128xf32>
    tpu.vector_store %arg6[%c0_26, %c0_27], %25 {strides = array<i32>} : memref<16x128xf32, #tpu.memory_space<vmem>>, vector<16x128xf32>,
    %c0_28 = arith.constant 0 : index
    %c0_29 = arith.constant 0 : index
    %27 = vector.load %arg6[%c0_28, %c0_29] : memref<16x128xf32, #tpu.memory_space<vmem>>, vector<16x128xf32>
    %c0_30 = arith.constant 0 : index
    %c0_31 = arith.constant 0 : index
    %c0_32 = arith.constant 0 : index
    %28 = vector.load %arg5[%c0_30, %c0_31, %c0_32] : memref<1x16x128xf32, #tpu.memory_space<vmem>>, vector<1x16x128xf32>
    %29 = vector.shape_cast %28 : vector<1x16x128xf32> to vector<16x128xf32>
    %30 = vector.shape_cast %27 : vector<16x128xf32> to vector<1x16x128xf32>
    tpu.vector_store %arg5[%c0_30, %c0_31, %c0_32], %30 {strides = array<i32>} : memref<1x16x128xf32, #tpu.memory_space<vmem>>, vector<1x16x128xf32>,
    return
  }
  func.func @transform_0(%arg0: i32, %arg1: i32) -> (i32, i32, i32) {
    %c0_i32 = arith.constant 0 : i32
    %c0_i32_0 = arith.constant 0 : i32
    %c0_i32_1 = arith.constant 0 : i32
    return %arg0, %c0_i32, %c0_i32_0 : i32, i32, i32
  }
  func.func @transform_1(%arg0: i32, %arg1: i32) -> (i32, i32, i32) {
    %c0_i32 = arith.constant 0 : i32
    %c0_i32_0 = arith.constant 0 : i32
    %c0_i32_1 = arith.constant 0 : i32
    return %c0_i32, %arg1, %c0_i32_0 : i32, i32, i32
  }
  func.func @transform_2(%arg0: i32, %arg1: i32) -> (i32, i32) {
    %c0_i32 = arith.constant 0 : i32
    %c0_i32_0 = arith.constant 0 : i32
    return %arg1, %c0_i32 : i32, i32
  }
  func.func @transform_3(%arg0: i32, %arg1: i32) -> (i32, i32, i32) {
    %c0_i32 = arith.constant 0 : i32
    %c0_i32_0 = arith.constant 0 : i32
    return %arg0, %arg1, %c0_i32 : i32, i32, i32
  }
}

</mosaic_0001>

<bundles_post_ra>
// kernel: discriminator_forward.3
= control target key start
LH: loop header
LB: loop body
LE: loop exit
PB: predicated region body
PF: predicated region fallthrough
CT: control target
= control target key end

     0   :  { %s649_s12 = smov 0   ;;  %s651_s13 = smov 0   ;;  %s707_s0 = inlined_call_operand.vmem [shape: bf16[2,16,128], index: 0, kind: input, shape index: {}]   ;;  %s708_s1 = inlined_call_operand.vmem [shape: bf16[4,16,16], index: 1, kind: input, shape index: {}]   ;;  %s709_s2 = inlined_call_operand.vmem [shape: f32[16,1], index: 2, kind: input, shape index: {}]   ;;  %s710_s3 = inlined_call_operand.vmem [shape: bf16[2,16,128], index: 3, kind: output, shape index: {}]  }
   0x1   :  { %s653_s14 = smov 0  }
   0x2 LB: > { %s25_s15 = sadd.s32 1, %s619_s13  ;;  %p522_p0 = scmp.ge.s32.totalorder %s623_s14, 1  ;;  %s623_s14 = sphi %s653_s14, %s13_s14   ;;  %s619_s13 = sphi %s651_s13, %s712_s13   ;;  %s615_s12 = sphi %s649_s12, %s711_s12  }
   0x3   : > { %p27_p1 = scmp.ge.s32.totalorder %s25_s15, 2  ;;  %p173_p2 = scmp.lt.s32.totalorder %s623_s14, 3 }
   0x5   : > { %s714_s15 = smov (%p27_p1, %s25_s15), 0  ;;  %p174_p3 = pnand %p522_p0, %p173_p2 }
   0x6   : > { %p211_p4 = scmp.lt.s32.totalorder (!%p174_p3), %s615_s12, 1  ;;  %s626_s28 = smov (!%p174_p3), 127  }
   0x7   : > { %177 = sbr.rel (%p174_p3) target bundleno = 290 (0x122), region = 32  ;;  %s627_s29 = smov (!%p174_p3), 119  }
   0x8   : > { %s628_s30 = smov (!%p174_p3), 118  }
   0xc   : > { %s716_s12 = smov (!%p211_p4, %s615_s12), 1  ;;  %v563_v1 = vld [vmem:[%s708_s1 + $0x8] sm:$0xff]  ;;  %v564_v2 = vld [vmem:[%s708_s1 + $0x10] sm:$0xff]  ;;  %vm254_vm0 = vcmask 130048   ;;  %v565_v3 = vld [vmem:[%s708_s1 + $0x18] sm:$0xff]  ;;  %v625_v5 = vmov 0  }
   0xd   : > { %s559_s16 = sshll.u32 %s716_s12, 3  ;;  %v562_v4 = vld [vmem:[%s708_s1] sm:$0xff]  ;;  %599 = vset.pattern.permute.xlu0 %v625_v5  ;;  %600 = vset.pattern.permute.xlu1 %v625_v5  ;;  %v382_v13 = vld [vmem:[%s709_s2 + $0x8] sm:$0xff] }
   0xe   : > { %s215_s19 = scalar_lea.vmem %s707_s0, %s559_s16  ;;  %v381_v11 = vld [vmem:[%s709_s2] sm:$0xff]  ;;  %s236_s10 = scalar_lea.vmem %s710_s3, %s559_s16 }
   0xf   : > { %v561_v0 = vld [vmem:[%s215_s19] sm:$0xff] }
  0x10   : > { %292 = vmatpush.bf16.msra.mxu1 %v561_v0  ;;  %327 = vmatpush.bf16.msra.mxu2 %v561_v0 }
  0x11   : > { %362 = vmatpush.bf16.msra.mxu3 %v561_v0  ;;  %265 = vmatpush.bf16.msra.mxu0 %v561_v0 }
  0x13   : > { %542 = vmatmul.msk.bf16.vlgmr.msra.gmra.mxu1 %vm254_vm0, %v563_v1  ;;  %549 = vmatmul.msk.bf16.vlgmr.msra.gmra.mxu2 %vm254_vm0, %v564_v2 }
  0x14   : > { %556 = vmatmul.msk.bf16.vlgmr.msra.gmra.mxu3 %vm254_vm0, %v565_v3  ;;  %535 = vmatmul.msk.bf16.vlgmr.msra.gmra.mxu0 %vm254_vm0, %v562_v4 }
  0x90   : > { %v294_v6 = vpop.f32.mrf.mxu1 }
  0x91   : > { %299 = vrot.lane.b32.xlu0 %v294_v6, %s626_s28  ;;  %v267_v15 = vpop.f32.mrf.mxu0 }
  0x96   : > { %v329_v7 = vpop.f32.mrf.mxu2 }
  0x97   : > { %334 = vrot.lane.b32.xlu1 %v329_v7, %s627_s29  ;;  %v364_v8 = vpop.f32.mrf.mxu3 }
  0x98   : > { %v296_v9 = vpop.f32.mrf.mxu1  ;;  %369 = vrot.lane.b32.xlu2 %v364_v8, %s628_s30 }
  0x99   : > { %301 = vrot.lane.b32.xlu0 %v296_v9, %s626_s28  ;;  %v269_v20 = vpop.f32.mrf.mxu0 }
  0x9e   : > { %v331_v10 = vpop.f32.mrf.mxu2 }
  0x9f   : > { %336 = vrot.lane.b32.xlu1 %v331_v10, %s627_s29  ;;  %v366_v12 = vpop.f32.mrf.mxu3 }
  0xa0   : > { %371 = vrot.lane.b32.xlu2 %v366_v12, %s628_s30 }
  0xa1   : > { %385 = vperm.xlu0 %599, %v381_v11  }
  0xa7   : > { %390 = vperm.xlu1 %600, %v382_v13  }
  0xf2   : > { %v370_v19 = vpop.permute.xlu2 %369 }
  0xfa   : > { %v372_v28 = vpop.permute.xlu2 %371 }
 0x103   : > { %v300_v14 = vpop.permute.xlu0 %299 }
 0x104   : > { %v305_v18 = vadd.f32 %v300_v14, %v267_v15 }
 0x109   : > { %v335_v16 = vpop.permute.xlu1 %334 }
 0x10a   : > { %v340_v21 = vadd.f32 %v335_v16, %v305_v18 }
 0x10b   : > { %v302_v17 = vpop.permute.xlu0 %301 }
 0x10c   : > { %v306_v23 = vadd.f32 %v302_v17, %v269_v20  ;;  %v375_v26 = vadd.f32 %v370_v19, %v340_v21 }
 0x111   : > { %v337_v22 = vpop.permute.xlu1 %336 }
 0x112   : > { %v341_v25 = vadd.f32 %v337_v22, %v306_v23 }
 0x113   : > { %v386_v24 = vpop.permute.xlu0 %385 }
 0x114   : > { %v393_v27 = vadd.f32 %v386_v24, %v375_v26  ;;  %v376_v29 = vadd.f32 %v372_v28, %v341_v25 }
 0x116   : > { %v397_v31 = vmul.f32 0.2, %v393_v27  ;;  %vm395_vm1 = vcmp.ge.f32.partialorder %v393_v27, 0.0 }
 0x118   : > { %v399_v34 = vsel %vm395_vm1, %v393_v27, %v397_v31 }
 0x119   : > { %v391_v30 = vpop.permute.xlu1 %390 }
 0x11a   : > { %v394_v32 = vadd.f32 %v391_v30, %v376_v29 }
 0x11c   : > { %vm396_vm2 = vcmp.ge.f32.partialorder %v394_v32, 0.0  ;;  %v398_v33 = vmul.f32 0.2, %v394_v32 }
 0x11e   : > { %v400_v35 = vsel %vm396_vm2, %v394_v32, %v398_v33 }
 0x11f   : > { %v569_v36 = vpack.c.bf16 %v400_v35, %v399_v34 }
 0x121   : > { %570 = vst [vmem:[%s236_s10] sm:$0xff] %v569_v36  }
 0x122 PF: > { %s13_s14 = sadd.s32 1, %s623_s14   ;;  %s711_s12 = smov %s619_s13 }
 0x123   : > { %p10_p5 = scmp.ge.s32.totalorder %s13_s14, 4   ;;  %s712_s13 = smov %s714_s15 }
 0x125   :  { %12 = sbr.rel (!%p10_p5) target bundleno = 2 (0x2), region = 71 }

// kernel: discriminator_forward.4
= control target key start
LH: loop header
LB: loop body
LE: loop exit
PB: predicated region body
PF: predicated region fallthrough
CT: control target
= control target key end

     0   :  { %s699_s12 = smov 0   ;;  %s701_s13 = smov 0   ;;  %s751_s0 = inlined_call_operand.vmem [shape: bf16[2,16,128], index: 0, kind: input, shape index: {}]   ;;  %s752_s1 = inlined_call_operand.vmem [shape: bf16[4,16,16], index: 1, kind: input, shape index: {}]   ;;  %s753_s2 = inlined_call_operand.vmem [shape: f32[16,1], index: 2, kind: input, shape index: {}]   ;;  %s754_s3 = inlined_call_operand.vmem [shape: bf16[2,16,128], index: 3, kind: output, shape index: {}]  }
   0x1   :  { %s703_s14 = smov 0  }
   0x2 LB: > { %s25_s2 = sadd.s32 1, %s669_s13  ;;  %p569_p0 = scmp.ge.s32.totalorder %s673_s14, 1  ;;  %s673_s14 = sphi %s703_s14, %s13_s14   ;;  %s669_s13 = sphi %s701_s13, %s756_s13   ;;  %s665_s12 = sphi %s699_s12, %s755_s12  }
   0x3   : > { %p27_p1 = scmp.ge.s32.totalorder %s25_s2, 2  ;;  %p173_p2 = scmp.lt.s32.totalorder %s673_s14, 3 }
   0x5   : > { %s758_s2 = smov (%p27_p1, %s25_s2), 0  ;;  %p174_p3 = pnand %p569_p0, %p173_p2 }
   0x6   : > { %p211_p4 = scmp.lt.s32.totalorder (!%p174_p3), %s665_s12, 1  ;;  %s675_s27 = smov (!%p174_p3), 127  }
   0x7   : > { %177 = sbr.rel (%p174_p3) target bundleno = 432 (0x1b0), region = 32  ;;  %s676_s28 = smov (!%p174_p3), 123  }
   0x8   : > { %s677_s29 = smov (!%p174_p3), 122  }
   0xc   : > { %s760_s12 = smov (!%p211_p4, %s665_s12), 1  ;;  %v611_v1 = vld [vmem:[%s752_s1 + $0x8] sm:$0xff]  ;;  %v612_v2 = vld [vmem:[%s752_s1 + $0x10] sm:$0xff]  ;;  %vm254_vm0 = vcmask 130048   ;;  %v613_v3 = vld [vmem:[%s752_s1 + $0x18] sm:$0xff]  ;;  %v381_v11 = vlaneseq  ;;  %v678_v25 = vmov 0.0  }
   0xd   : > { %s607_s15 = sshll.u32 %s760_s12, 3  ;;  %v610_v4 = vld [vmem:[%s752_s1] sm:$0xff] }
   0xe   : > { %s215_s18 = scalar_lea.vmem %s751_s0, %s607_s15  ;;  %v382_v12 = vand.u32 127, %v381_v11  ;;  %s236_s5 = scalar_lea.vmem %s754_s3, %s607_s15 }
   0xf   : > { %v609_v0 = vld [vmem:[%s215_s18] sm:$0xff] }
  0x10   : > { %292 = vmatpush.bf16.msra.mxu1 %v609_v0  ;;  %327 = vmatpush.bf16.msra.mxu2 %v609_v0  ;;  %v383_v13 = vcvt.s32.f32 %v382_v12 }
  0x11   : > { %362 = vmatpush.bf16.msra.mxu3 %v609_v0  ;;  %265 = vmatpush.bf16.msra.mxu0 %v609_v0 }
  0x12   : > { %v384_v14 = vadd.f32 0.5, %v383_v13  ;;  %vm389_vm1 = vcmp.lt.f32.partialorder %v383_v13, 20.0 }
  0x13   : > { %589 = vmatmul.msk.bf16.vlgmr.msra.gmra.mxu1 %vm254_vm0, %v611_v1  ;;  %596 = vmatmul.msk.bf16.vlgmr.msra.gmra.mxu2 %vm254_vm0, %v612_v2 }
  0x14   : > { %603 = vmatmul.msk.bf16.vlgmr.msra.gmra.mxu3 %vm254_vm0, %v613_v3  ;;  %582 = vmatmul.msk.bf16.vlgmr.msra.gmra.mxu0 %vm254_vm0, %v610_v4  ;;  %v385_v15 = vmul.f32 0.2, %v384_v14 }
  0x16   : > { %v386_v16 = vfloor.f32 %v385_v15 }
  0x18   : > { %v387_v17 = vmul.f32 5.0, %v386_v16 }
  0x1a   : > { %v388_v18 = vsub.f32 %v383_v13, %v387_v17 }
  0x1c   : > { %vm390_vm2 = vcmp.lt.f32.partialorder %v388_v18, 4.0 }
  0x1d   : > { %vm391_vm3 = vmand %vm389_vm1, %vm390_vm2 }
  0x1e   : > { %v604_v26 = vsel %vm391_vm3, 1.0, %v678_v25 }
  0x90   : > { %v294_v5 = vpop.f32.mrf.mxu1 }
  0x91   : > { %299 = vrot.lane.b32.xlu0 %v294_v5, %s675_s27  ;;  %v267_v20 = vpop.f32.mrf.mxu0 }
  0x96   : > { %v329_v6 = vpop.f32.mrf.mxu2 }
  0x97   : > { %334 = vrot.lane.b32.xlu1 %v329_v6, %s676_s28  ;;  %v364_v7 = vpop.f32.mrf.mxu3 }
  0x98   : > { %v296_v8 = vpop.f32.mrf.mxu1  ;;  %369 = vrot.lane.b32.xlu2 %v364_v7, %s677_s29 }
  0x99   : > { %301 = vrot.lane.b32.xlu0 %v296_v8, %s675_s27  ;;  %v269_v30 = vpop.f32.mrf.mxu0 }
  0x9e   : > { %v331_v9 = vpop.f32.mrf.mxu2 }
  0x9f   : > { %336 = vrot.lane.b32.xlu1 %v331_v9, %s676_s28  ;;  %v366_v10 = vpop.f32.mrf.mxu3 }
  0xa0   : > { %371 = vrot.lane.b32.xlu2 %v366_v10, %s677_s29 }
  0xf2   : > { %v370_v22 = vpop.permute.xlu2 %369 }
  0xfa   : > { %v372_v35 = vpop.permute.xlu2 %371 }
 0x103   : > { %v300_v19 = vpop.permute.xlu0 %299 }
 0x104   : > { %v305_v21 = vadd.f32 %v300_v19, %v267_v20 }
 0x109   : > { %v335_v23 = vpop.permute.xlu1 %334 }
 0x10a   : > { %v340_v24 = vadd.f32 %v335_v23, %v305_v21 }
 0x10b   : > { %v302_v28 = vpop.permute.xlu0 %301 }
 0x10c   : > { %v375_v27 = vadd.f32 %v370_v22, %v340_v24  ;;  %v306_v31 = vadd.f32 %v302_v28, %v269_v30 }
 0x10e   : > { %v394_v29 = vmul.f32 %v604_v26, %v375_v27 }
 0x110   : > { %396 = vadd.xlane.f32.xlu0 %v394_v29  ;;  %v402_v32 = vmul.f32 %v394_v29, %v375_v27 }
 0x111   : > { %v337_v33 = vpop.permute.xlu1 %336 }
 0x112   : > { %v341_v34 = vadd.f32 %v337_v33, %v306_v31  ;;  %404 = vadd.xlane.f32.xlu2 %v402_v32 }
 0x114   : > { %v376_v36 = vadd.f32 %v372_v35, %v341_v34 }
 0x116   : > { %v395_v37 = vmul.f32 %v604_v26, %v376_v36 }
 0x118   : > { %398 = vadd.xlane.f32.xlu1 %v395_v37  ;;  %v403_v38 = vmul.f32 %v395_v37, %v376_v36 }
 0x11a   : > { %406 = vadd.xlane.f32.xlu2 %v403_v38 }
 0x183   : > { %v397_v39 = vpop.xlane.xlu0 %396 }
 0x184   : > { %v400_v40 = vmul.f32 0.0625, %v397_v39 }
 0x185   : > { %v405_v41 = vpop.xlane.xlu2 %404 }
 0x186   : > { %v410_v42 = vmul.f32 %v400_v40, %v400_v40  ;;  %v408_v43 = vmul.f32 0.0625, %v405_v41  ;;  %v416_v2 = vsub.f32 %v375_v27, %v400_v40 }
 0x188   : > { %v412_v44 = vsub.f32 %v408_v43, %v410_v42 }
 0x18a   : > { %v414_v45 = vmax.f32 %v412_v44, 0.0 }
 0x18b   : > { %v399_v46 = vpop.xlane.xlu1 %398 }
 0x18c   : > { %v418_v47 = vadd.f32 1e-05, %v414_v45  ;;  %v401_v48 = vmul.f32 0.0625, %v399_v46 }
 0x18d   : > { %v407_v49 = vpop.xlane.xlu2 %406 }
 0x18e   : > { %647 = vrsqrt.f32 %v418_v47  ;;  %v411_v50 = vmul.f32 %v401_v48, %v401_v48  ;;  %v409_v51 = vmul.f32 0.0625, %v407_v49  ;;  %vm426_vm5 = vweird.f32 %v418_v47 }
 0x18f   : > { %v417_v6 = vsub.f32 %v376_v36, %v401_v48 }
 0x190   : > { %v413_v52 = vsub.f32 %v409_v51, %v411_v50 }
 0x192   : > { %v415_v53 = vmax.f32 %v413_v52, 0.0 }
 0x194   : > { %v648_v54 = vpop.eup %647  ;;  %v419_v56 = vadd.f32 1e-05, %v415_v53 }
 0x195   : > { %v421_v55 = vmul.f32 %v648_v54, %v418_v47  ;;  %vm427_vm4 = vweird.f32 %v648_v54 }
 0x196   : > { %649 = vrsqrt.f32 %v419_v56  ;;  %vm428_vm6 = vmor %vm426_vm5, %vm427_vm4  ;;  %vm436_vm8 = vweird.f32 %v419_v56 }
 0x197   : > { %v422_v57 = vmul.f32 %v648_v54, %v421_v55 }
 0x199   : > { %v423_v58 = vmul.f32 0.5, %v422_v57 }
 0x19b   : > { %v424_v59 = vsub.f32 1.5, %v423_v58 }
 0x19c   : > { %v650_v60 = vpop.eup %649 }
 0x19d   : > { %v425_v61 = vmul.f32 %v648_v54, %v424_v59  ;;  %v431_v62 = vmul.f32 %v650_v60, %v419_v56  ;;  %vm437_vm7 = vweird.f32 %v650_v60 }
 0x19e   : > { %vm438_vm9 = vmor %vm436_vm8, %vm437_vm7 }
 0x19f   : > { %v432_v63 = vmul.f32 %v650_v60, %v431_v62  ;;  %v429_v0 = vsel %vm428_vm6, %v648_v54, %v425_v61 }
 0x1a0   : > { %v440_v4 = vmul.f32 %v429_v0, %v416_v2 }
 0x1a1   : > { %v433_v1 = vmul.f32 0.5, %v432_v63 }
 0x1a2   : > { %v444_v8 = vmul.f32 0.2, %v440_v4  ;;  %vm442_vm10 = vcmp.ge.f32.partialorder %v440_v4, 0.0 }
 0x1a3   : > { %v434_v3 = vsub.f32 1.5, %v433_v1 }
 0x1a4   : > { %v446_v11 = vsel %vm442_vm10, %v440_v4, %v444_v8 }
 0x1a5   : > { %v435_v5 = vmul.f32 %v650_v60, %v434_v3 }
 0x1a7   : > { %v439_v7 = vsel %vm438_vm9, %v650_v60, %v435_v5 }
 0x1a8   : > { %v441_v9 = vmul.f32 %v439_v7, %v417_v6 }
 0x1aa   : > { %vm443_vm11 = vcmp.ge.f32.partialorder %v441_v9, 0.0  ;;  %v445_v10 = vmul.f32 0.2, %v441_v9 }
 0x1ac   : > { %v447_v12 = vsel %vm443_vm11, %v441_v9, %v445_v10 }
 0x1ad   : > { %v617_v13 = vpack.c.bf16 %v447_v12, %v446_v11 }
 0x1af   : > { %618 = vst [vmem:[%s236_s5] sm:$0xff] %v617_v13  }
 0x1b0 PF: > { %s13_s14 = sadd.s32 1, %s673_s14   ;;  %s755_s12 = smov %s669_s13 }
 0x1b1   : > { %p10_p5 = scmp.ge.s32.totalorder %s13_s14, 4   ;;  %s756_s13 = smov %s758_s2 }
 0x1b3   :  { %12 = sbr.rel (!%p10_p5) target bundleno = 2 (0x2), region = 71 }

// kernel: discriminator_forward.5
= control target key start
LH: loop header
LB: loop body
LE: loop exit
PB: predicated region body
PF: predicated region fallthrough
CT: control target
= control target key end

     0   :  { %s631_s12 = smov 0   ;;  %s633_s13 = smov 0   ;;  %s683_s0 = inlined_call_operand.vmem [shape: bf16[2,32,128], index: 0, kind: input, shape index: {}]   ;;  %s684_s1 = inlined_call_operand.vmem [shape: bf16[4,16,32], index: 1, kind: input, shape index: {}]   ;;  %s685_s2 = inlined_call_operand.vmem [shape: f32[16,1], index: 2, kind: input, shape index: {}]   ;;  %s686_s3 = inlined_call_operand.vmem [shape: f32[2,16,128], index: 3, kind: output, shape index: {}]  }
   0x1   :  { %s635_s14 = smov 0  }
   0x2 LB: > { %s25_s2 = sadd.s32 1, %s602_s13  ;;  %p508_p0 = scmp.ge.s32.totalorder %s606_s14, 1  ;;  %s606_s14 = sphi %s635_s14, %s13_s14   ;;  %s602_s13 = sphi %s633_s13, %s688_s13   ;;  %s598_s12 = sphi %s631_s12, %s687_s12  }
   0x3   : > { %p27_p1 = scmp.ge.s32.totalorder %s25_s2, 2  ;;  %p173_p2 = scmp.lt.s32.totalorder %s606_s14, 3 }
   0x5   : > { %s690_s2 = smov (%p27_p1, %s25_s2), 0  ;;  %p174_p3 = pnand %p508_p0, %p173_p2 }
   0x6   : > { %p211_p4 = scmp.lt.s32.totalorder (!%p174_p3), %s598_s12, 1  ;;  %s608_s27 = smov (!%p174_p3), 127  }
   0x7   : > { %177 = sbr.rel (%p174_p3) target bundleno = 283 (0x11b), region = 32  ;;  %s609_s28 = smov (!%p174_p3), 125  }
   0x8   : > { %s610_s29 = smov (!%p174_p3), 124  }
   0xc   : > { %s692_s12 = smov (!%p211_p4, %s598_s12), 1  ;;  %v554_v2 = vld [vmem:[%s684_s1 + $0x8] sm:$0xff]  ;;  %v555_v3 = vld [vmem:[%s684_s1 + $0x10] sm:$0xff]  ;;  %vm262_vm0 = vcmask 261120   ;;  %v556_v4 = vld [vmem:[%s684_s1 + $0x18] sm:$0xff] }
   0xd   : > { %s549_s15 = sshll.u32 %s692_s12, 4  ;;  %v553_v5 = vld [vmem:[%s684_s1] sm:$0xff] }
   0xe   : > { %s215_s18 = scalar_lea.vmem %s683_s0, %s549_s15  ;;  %s236_s5 = scalar_lea.vmem %s686_s3, %s549_s15 }
   0xf   : > { %v552_v0 = vld [vmem:[%s215_s18 + $0x8] sm:$0xff]  ;;  %v551_v1 = vld [vmem:[%s215_s18] sm:$0xff] }
  0x10   : > { %299 = vmatpush.bf16.msra.mxu1 %v552_v0  ;;  %334 = vmatpush.bf16.msra.mxu2 %v552_v0 }
  0x11   : > { %369 = vmatpush.bf16.msra.mxu3 %v552_v0  ;;  %272 = vmatpush.bf16.msra.mxu0 %v552_v0 }
  0x14   : > { %300 = vmatpush.bf16.msra.mxu1 %v551_v1  ;;  %335 = vmatpush.bf16.msra.mxu2 %v551_v1 }
  0x15   : > { %370 = vmatpush.bf16.msra.mxu3 %v551_v1  ;;  %273 = vmatpush.bf16.msra.mxu0 %v551_v1 }
  0x17   : > { %532 = vmatmul.msk.bf16.vlgmr.msra.gmra.mxu1 %vm262_vm0, %v554_v2  ;;  %539 = vmatmul.msk.bf16.vlgmr.msra.gmra.mxu2 %vm262_vm0, %v555_v3 }
  0x18   : > { %546 = vmatmul.msk.bf16.vlgmr.msra.gmra.mxu3 %vm262_vm0, %v556_v4  ;;  %525 = vmatmul.msk.bf16.vlgmr.msra.gmra.mxu0 %vm262_vm0, %v553_v5 }
  0x94   : > { %v302_v6 = vpop.f32.mrf.mxu1 }
  0x95   : > { %307 = vrot.lane.b32.xlu0 %v302_v6, %s608_s27  ;;  %v275_v13 = vpop.f32.mrf.mxu0 }
  0x9a   : > { %v337_v7 = vpop.f32.mrf.mxu2 }
  0x9b   : > { %342 = vrot.lane.b32.xlu1 %v337_v7, %s609_s28  ;;  %v372_v8 = vpop.f32.mrf.mxu3 }
  0x9c   : > { %v304_v9 = vpop.f32.mrf.mxu1  ;;  %377 = vrot.lane.b32.xlu2 %v372_v8, %s610_s29 }
  0x9d   : > { %309 = vrot.lane.b32.xlu0 %v304_v9, %s608_s27  ;;  %v277_v20 = vpop.f32.mrf.mxu0 }
  0xa2   : > { %v339_v10 = vpop.f32.mrf.mxu2 }
  0xa3   : > { %344 = vrot.lane.b32.xlu1 %v339_v10, %s609_s28  ;;  %v374_v11 = vpop.f32.mrf.mxu3 }
  0xa4   : > { %379 = vrot.lane.b32.xlu2 %v374_v11, %s610_s29 }
  0xf6   : > { %v378_v15 = vpop.permute.xlu2 %377 }
  0xfe   : > { %v380_v24 = vpop.permute.xlu2 %379 }
 0x107   : > { %v308_v12 = vpop.permute.xlu0 %307 }
 0x108   : > { %v313_v14 = vadd.f32 %v308_v12, %v275_v13 }
 0x10d   : > { %v343_v16 = vpop.permute.xlu1 %342 }
 0x10e   : > { %v348_v17 = vadd.f32 %v343_v16, %v313_v14 }
 0x10f   : > { %v310_v19 = vpop.permute.xlu0 %309 }
 0x110   : > { %v383_v18 = vadd.f32 %v378_v15, %v348_v17  ;;  %v314_v21 = vadd.f32 %v310_v19, %v277_v20 }
 0x112   : > { %389 = vst [vmem:[%s236_s5] sm:$0xff] %v383_v18 }
 0x115   : > { %v345_v22 = vpop.permute.xlu1 %344 }
 0x116   : > { %v349_v23 = vadd.f32 %v345_v22, %v314_v21 }
 0x118   : > { %v384_v25 = vadd.f32 %v380_v24, %v349_v23 }
 0x11a   : > { %390 = vst [vmem:[%s236_s5 + $0x8] sm:$0xff] %v384_v25 }
 0x11b PF: > { %s13_s14 = sadd.s32 1, %s606_s14   ;;  %s687_s12 = smov %s602_s13 }
 0x11c   : > { %p10_p5 = scmp.ge.s32.totalorder %s13_s14, 4   ;;  %s688_s13 = smov %s690_s2 }
 0x11e   :  { %12 = sbr.rel (!%p10_p5) target bundleno = 2 (0x2), region = 71 }

</bundles_post_ra>
